<compile_context>
chip_gen: v6e
topology: v6e:2x2x1
jax: 0.10.0
libtpu: 0.0.40
codegen_flags: <defaults>
</compile_context>

<pallas_src>
import jax
import jax.numpy as jnp
from jax.experimental import pallas as pl
from jax.experimental.pallas import tpu as pltpu


def _round_up(x, m):
    return ((x + m - 1) // m) * m


def _patch_embed_kernel(x_ref, w_ref, b_ref, o_ref):
    # x_ref: (tm, K) compute_dtype; w_ref: (K, E) compute_dtype;
    # b_ref: (1, E) f32; o_ref: (tm, E) out_dtype.
    acc = jnp.dot(x_ref[...], w_ref[...], preferred_element_type=jnp.float32)
    o_ref[...] = (acc + b_ref[...]).astype(o_ref.dtype)


def _pick_tm(M, tm_max=512):
    if M <= 256:
        return _round_up(M, 16)              # bf16 packs 16 rows per sublane group
    if M <= 2 * tm_max:
        # Split into >= 2 blocks so both v7x TensorCores get work; keep 256-aligned.
        return _round_up(-(-M // 2), 256)
    return tm_max


def patch_embed(x, weight, bias, patch_size, *, tm=None,
                compute_dtype=jnp.bfloat16, out_dtype=None):
    """x: (B, C, H, W) NCHW; weight: (E, C, p, p); bias: (E,). Returns (B, N, E)."""
    B, C, H, W = x.shape
    E = weight.shape[0]
    p = patch_size
    hp, wp = H // p, W // p
    N = hp * wp
    K = C * p * p
    M = B * N
    if out_dtype is None:
        out_dtype = x.dtype                   # strict parity with the PyTorch forward

    # --- glue (layout plumbing only): cast to the compute dtype first so this pass
    # writes half the bytes, then extract non-overlapping patches.
    # Rows = (b, ph, pw) row-major; cols = (c, kh, kw) matching the conv weight layout.
    xc = x.astype(compute_dtype)
    xp = (xc.reshape(B, C, hp, p, wp, p)
            .transpose(0, 2, 4, 1, 3, 5)      # (B, hp, wp, C, p, p)
            .reshape(M, K))
    wmat = weight.reshape(E, K).T.astype(compute_dtype)   # (K, E)
    bmat = bias.reshape(1, E).astype(jnp.float32)

    # --- tiling: no padding. Full-dim K / E blocks; ragged trailing M block is fine
    # (garbage rows only feed discarded out-of-bounds output rows).
    if tm is None:
        tm = _pick_tm(M)
    else:
        tm = min(tm, _round_up(M, 16))
    grid_m = pl.cdiv(M, tm)

    in_isize = jnp.dtype(compute_dtype).itemsize
    out_isize = jnp.dtype(out_dtype).itemsize

    # VMEM: double-buffered x/out tiles, single-buffered resident weight + bias row.
    est_vmem = (2 * tm * K * in_isize + K * E * in_isize
                + 2 * tm * E * out_isize + E * 4)
    vmem_limit = int(min(max(2 * est_vmem, 32 * 1024 * 1024), 48 * 1024 * 1024))

    cost = pl.CostEstimate(
        flops=2 * M * K * E,
        transcendentals=0,
        bytes_accessed=(M * K * in_isize + K * E * in_isize
                        + E * 4 + M * E * out_isize),
    )

    out = pl.pallas_call(
        _patch_embed_kernel,
        out_shape=jax.ShapeDtypeStruct((M, E), out_dtype),
        grid_spec=pltpu.PrefetchScalarGridSpec(
            num_scalar_prefetch=0,
            grid=(grid_m,),
            in_specs=[
                # patch-row tile; K == full dim (legal even when K % 128 != 0)
                pl.BlockSpec((tm, K), lambda i: (i, 0)),
                # full weight, resident and single-buffered (block never changes)
                pl.BlockSpec((K, E), lambda i: (0, 0),
                             pipeline_mode=pl.Buffered(1)),
                # bias row, resident and single-buffered
                pl.BlockSpec((1, E), lambda i: (0, 0),
                             pipeline_mode=pl.Buffered(1)),
            ],
            out_specs=pl.BlockSpec((tm, E), lambda i: (i, 0)),
        ),
        compiler_params=pltpu.CompilerParams(
            dimension_semantics=("parallel",),
            vmem_limit_bytes=vmem_limit),
        cost_estimate=cost,
    )(xp, wmat, bmat)

    return out.reshape(B, N, E)               # metadata-only reshape, no extra HBM pass


if __name__ == "__main__":
    # Small, forward-consistent shapes: img=16, patch=4, in_channels=4, embed_dim=32
    B, C, IMG, P, E = 2, 4, 16, 4, 32

    key = jax.random.PRNGKey(0)
    kx, kw, kb = jax.random.split(key, 3)
    x = jax.random.normal(kx, (B, C, IMG, IMG), dtype=jnp.float32)
    weight = jax.random.normal(kw, (E, C, P, P), dtype=jnp.float32) * 0.02
    bias = jax.random.normal(kb, (E,), dtype=jnp.float32) * 0.02

    out = patch_embed(x, weight, bias, P)
    out = jax.block_until_ready(out)

    # Reference check against plain-JAX strided conv (same as the PyTorch forward).
    ref = jax.lax.conv_general_dilated(
        x, weight, window_strides=(P, P), padding="VALID",
        dimension_numbers=("NCHW", "OIHW", "NCHW"))
    ref = ref + bias.reshape(1, E, 1, 1)
    ref = ref.reshape(B, E, -1).transpose(0, 2, 1)   # flatten(2).transpose(1,2)

    assert out.shape == (B, (IMG // P) * (IMG // P), E)
    assert out.dtype == x.dtype
    # bf16 inputs with f32 accumulation -> slightly relaxed tolerance vs f32 reference.
    assert jnp.allclose(out, ref, atol=2e-2, rtol=2e-2)
    print("KERNEL_OK")
</pallas_src>

<mosaic_0001>
module attributes {stable_mosaic.version = 11 : i64} {
  func.func @_patch_embed_kernel(%arg0: i32, %arg1: memref<32x64xbf16, #tpu.memory_space<vmem>>, %arg2: memref<64x32xbf16, #tpu.memory_space<vmem>>, %arg3: memref<1x32xf32, #tpu.memory_space<vmem>>, %arg4: memref<32x32xf32, #tpu.memory_space<vmem>>) attributes {dimension_semantics = [#tpu.dimension_semantics<parallel>], iteration_bounds = array<i64: 1>, scalar_prefetch = 0 : i64, scratch_operands = 0 : i64, tpu.core_type = #tpu.core_type<tc>, window_params = [{transform_indices = @transform_0, window_bounds = array<i64: 32, 64>}, {pipeline_mode = #tpu.pipeline_mode<synchronous>, transform_indices = @transform_1, window_bounds = array<i64: 64, 32>}, {pipeline_mode = #tpu.pipeline_mode<synchronous>, transform_indices = @transform_2, window_bounds = array<i64: 1, 32>}, {transform_indices = @transform_3, window_bounds = array<i64: 32, 32>}]} {
    %c0 = arith.constant 0 : index
    %c0_0 = arith.constant 0 : index
    %0 = vector.load %arg1[%c0, %c0_0] : memref<32x64xbf16, #tpu.memory_space<vmem>>, vector<32x64xbf16>
    %c0_1 = arith.constant 0 : index
    %c0_2 = arith.constant 0 : index
    %1 = vector.load %arg2[%c0_1, %c0_2] : memref<64x32xbf16, #tpu.memory_space<vmem>>, vector<64x32xbf16>
    %cst = arith.constant dense<0.000000e+00> : vector<32x32xf32>
    %2 = tpu.matmul %0, %1, %cst {dimension_numbers = #tpu.dot_dimension_numbers<[1], [0], [0], [1], [0, 0, 1, 1], [], []>} : vector<32x64xbf16>, vector<64x32xbf16>, vector<32x32xf32> -> vector<32x32xf32>
    %c0_3 = arith.constant 0 : index
    %c0_4 = arith.constant 0 : index
    %3 = vector.load %arg3[%c0_3, %c0_4] : memref<1x32xf32, #tpu.memory_space<vmem>>, vector<1x32xf32>
    %4 = vector.broadcast %3 : vector<1x32xf32> to vector<32x32xf32>
    %5 = arith.addf %2, %4 : vector<32x32xf32>
    %c0_5 = arith.constant 0 : index
    %c0_6 = arith.constant 0 : index
    %6 = vector.load %arg4[%c0_5, %c0_6] : memref<32x32xf32, #tpu.memory_space<vmem>>, vector<32x32xf32>
    tpu.vector_store %arg4[%c0_5, %c0_6], %5 {strides = array<i32>} : memref<32x32xf32, #tpu.memory_space<vmem>>, vector<32x32xf32>,
    return
  }
  func.func @transform_0(%arg0: i32) -> (i32, i32) {
    %c0_i32 = arith.constant 0 : i32
    %c0_i32_0 = arith.constant 0 : i32
    return %arg0, %c0_i32 : i32, i32
  }
  func.func @transform_1(%arg0: i32) -> (i32, i32) {
    %c0_i32 = arith.constant 0 : i32
    %c0_i32_0 = arith.constant 0 : i32
    %c0_i32_1 = arith.constant 0 : i32
    return %c0_i32, %c0_i32_0 : i32, i32
  }
  func.func @transform_2(%arg0: i32) -> (i32, i32) {
    %c0_i32 = arith.constant 0 : i32
    %c0_i32_0 = arith.constant 0 : i32
    %c0_i32_1 = arith.constant 0 : i32
    return %c0_i32, %c0_i32_0 : i32, i32
  }
  func.func @transform_3(%arg0: i32) -> (i32, i32) {
    %c0_i32 = arith.constant 0 : i32
    %c0_i32_0 = arith.constant 0 : i32
    return %arg0, %c0_i32 : i32, i32
  }
}

</mosaic_0001>

<bundles_post_ra>
// kernel: tpu_custom_call.1
= control target key start
LH: loop header
LB: loop body
LE: loop exit
PB: predicated region body
PF: predicated region fallthrough
CT: control target
= control target key end

     0   :  { %vm69_vm0 = vcmask 523264   ;;  %s251_s0 = inlined_call_operand.vmem [shape: bf16[32,64], index: 0, kind: input, shape index: {}]   ;;  %s252_s1 = inlined_call_operand.vmem [shape: bf16[64,32], index: 1, kind: input, shape index: {}]   ;;  %s253_s2 = inlined_call_operand.vmem [shape: f32[1,32], index: 2, kind: input, shape index: {}]   ;;  %s254_s3 = inlined_call_operand.hbm [shape: f32[32,32], index: 3, kind: output, shape index: {}]  }
   0x1   :  { %v176_v0 = vld [vmem:[%s252_s1 + $0x18] sm:$0xff]   ;;  %v177_v1 = vld [vmem:[%s252_s1 + $0x10] sm:$0xff]   ;;  %v178_v2 = vld [vmem:[%s252_s1 + $0x8] sm:$0xff]  }
   0x2   :  { %161 = vmatprep.subr.bf16.mxu0 %v176_v0  ;;  %v180_v3 = vld [vmem:[%s251_s0] sm:$0xff]  }
   0x3   :  { %162 = vmatpush3.bf16.msra.mxu0 %v176_v0  ;;  %169 = vmatprep.mubr.msk.bf16.mxu0 %vm69_vm0, %v180_v3 }
   0x4   :  { %163 = vmatprep.subr.bf16.mxu0 %v177_v1 }
   0x5   :  { %8 = vsyncpa [#allocation3], 0  ;;  %v179_v4 = vld [vmem:[%s252_s1] sm:$0xff]   ;;  %v181_v5 = vld [vmem:[%s251_s0 + $0x8] sm:$0xff]   ;;  %vm125_vm1 = vcmask 261120   ;;  %s204_s26 = smov [#allocation2]  }
   0x6   :  { %v146_v6 = vld [vmem:[%s253_s2] ss:$0 sm:$0xff]  ;;  %s135_s1 = sshll.u32 %s204_s26, 4  ;;  %s136_s1 = int_to_ptr.vmem [resolvable:$true] %s135_s1 }
   0x7   :  { %164 = vmatpush3.bf16.msra.mxu0 %v177_v1  ;;  %s182_s0 = scalar_lea.vmem %s136_s1, 512  ;;  %p187_p1 = scmp.lt.s32.totalorder %s136_s1, %s136_s1 }
   0x8   :  { %165 = vmatprep.subr.bf16.mxu0 %v178_v2  ;;  %p183_p0 = scmp.ne.s32.totalorder %s136_s1, %s182_s0  ;;  %p188_p2 = scmp.lt.s32.totalorder %s182_s0, %s182_s0 }
   0xa   :  { %p189_p3 = por %p188_p2, %p187_p1 }
   0xb   :  { %166 = vmatpush3.bf16.msra.mxu0 %v178_v2 }
   0xc   :  { %167 = vmatprep.subr.bf16.mxu0 %v179_v4  ;;  %p190_p4 = pnand %p189_p3, %p183_p0 }
   0xf   :  { %168 = vmatpush3.bf16.msra.mxu0 %v179_v4 }
  0x12   :  { %170 = vmatmul.mubr.msk.bf16.vlgmr.msra.gmra.mxu0 %vm69_vm0, %v181_v5 }
  0xd2   :  { %v171_v7 = vpop.f32.mrf.mxu0 }
  0xd3   :  { %v119_v8 = vadd.f32 %v171_v7, %v146_v6 }
  0xd4   :  { %v110_v9 = vpop.f32.mrf.mxu0 }
  0xd5   :  { %128 = vst.msk [vmem:[#allocation2 + $0x10] sm:$0xff] %vm125_vm1, %v119_v8  ;;  %v111_v10 = vadd.f32 %v146_v6, %v110_v9 }
  0xd6   :  { %v172_v11 = vpop.f32.mrf.mxu0 }
  0xd7   :  { %126 = vst.msk [vmem:[#allocation2] sm:$0xff] %vm125_vm1, %v111_v10  ;;  %v122_v12 = vadd.f32 %v172_v11, %v146_v6 }
  0xd8   :  { %v113_v13 = vpop.f32.mrf.mxu0 }
  0xd9   :  { %129 = vst.msk [vmem:[#allocation2 + $0x18] sm:$0xff] %vm125_vm1, %v122_v12  ;;  %v114_v14 = vadd.f32 %v146_v6, %v113_v13 }
  0xdb   :  { %127 = vst.msk [vmem:[#allocation2 + $0x8] sm:$0xff] %vm125_vm1, %v114_v14 }
  0xdc   :  { %193 = shalt.err (!%p190_p4)
}
  0xdd   :  { %s205_s2 = smov 128   ;;  %s206_s27 = smov 8  }
  0xde   :  { %141 = dma.vmem_to_hbm [thread:$0]  %s136_s1, 512, %s254_s3, [#allocation3], %s205_s2, %s205_s2, %s206_s27  }
  0xdf   :  { %202 = dma.done.wait [#allocation3], 512  }
  0xe0   :  { %203 = vsyncadd [#allocation3], 4294966784 }
  0xe1   :  { %145 = vsyncpa [#allocation3], 1 }

</bundles_post_ra>
